<compile_context>
chip_gen: v5e
topology: v5e:2x2
jax: 0.10.0
libtpu: 0.0.40
codegen_flags: <defaults>
</compile_context>

<pallas_src>
import math
import jax
import jax.numpy as jnp
from jax.experimental import pallas as pl
from jax.experimental.pallas import tpu as pltpu

# ---------------- synthetic "args" / model config (small shapes) -------------
B, L = 2, 8            # batch, max_len
H = 32                 # roberta_hidden_dim
NUM_HEADS = 2
DH = H // NUM_HEADS
FF = 64                # intermediate size
NUM_LAYERS = 2
VOCAB = 100
NUM_LABELS = 3         # args.num_labels (squeeze(-1) is a no-op unless == 1)
LN_EPS = 1e-5

NUM_VECS = 10          # packed per-layer vectors: bq,bk,bv,bo,g1,be1,bf1,bf2,g2,be2
OUT_PAD = 128          # lane-dense padded width of the head output


# ---------------- small math helpers (used in kernel & reference) ------------
def _layer_norm(x, g, b):
    mu = jnp.mean(x, axis=-1, keepdims=True)
    var = jnp.mean((x - mu) ** 2, axis=-1, keepdims=True)
    return (x - mu) * jax.lax.rsqrt(var + LN_EPS) * g + b


def _gelu(x):
    # TODO(synk): HF RoBERTa uses erf-based GELU; tanh approximation kept here
    # (reference below uses the same, so the numerical check is consistent).
    return 0.5 * x * (1.0 + jnp.tanh(0.7978845608028654 * (x + 0.044715 * x * x * x)))


# ---------------- fused encoder + head kernel --------------------------------
def fused_encoder_head_kernel(x0_ref, addm_ref, w_attn_ref, w_ff1_ref,
                              w_ff2_ref, vecs_ref, wp_ref, wm_ref, hvec_ref,
                              score_ref, x_sc):
    l = pl.program_id(0)
    last = pl.num_programs(0) - 1

    @pl.when(l == 0)
    def _init():
        x_sc[...] = x0_ref[...]                    # load embedded activations once
        score_ref[...] = jnp.zeros_like(score_ref)

    x = x_sc[...]                                  # (B*L, H) f32, VMEM-resident
    addm = addm_ref[...]                           # (B, L)   f32 additive mask

    vecs = vecs_ref[0]                             # (NUM_VECS, FF) f32
    bq = vecs[0:1, :H]
    bk = vecs[1:2, :H]
    bv = vecs[2:3, :H]
    bo = vecs[3:4, :H]
    g1 = vecs[4:5, :H]
    be1 = vecs[5:6, :H]
    bf1 = vecs[6:7, :FF]
    bf2 = vecs[7:8, :H]
    g2 = vecs[8:9, :H]
    be2 = vecs[9:10, :H]

    # ---- self-attention: fused QKV projections (bf16 MXU, f32 accumulate) ---
    xb = x.astype(jnp.bfloat16)
    wq = w_attn_ref[0, 0]                          # (H, H) bf16
    wk = w_attn_ref[0, 1]
    wv = w_attn_ref[0, 2]
    wo = w_attn_ref[0, 3]
    q = jnp.dot(xb, wq, preferred_element_type=jnp.float32) + bq
    k = jnp.dot(xb, wk, preferred_element_type=jnp.float32) + bk
    v = jnp.dot(xb, wv, preferred_element_type=jnp.float32) + bv

    q3 = q.reshape(B, L, H)
    k3 = k.reshape(B, L, H)
    v3 = v.reshape(B, L, H)

    scale = 1.0 / math.sqrt(DH)
    addm3 = addm[:, None, :]                       # (B, 1, L) -> broadcast over queries

    # Heads: static unroll; the concat along lanes is removed by folding the
    # per-head output projection (sum_h ctx_h @ wo[rows_h]) directly.
    # TODO(synk): at real NUM_HEADS=12 / H=768 switch to one batched
    # 'blhd,bmhd->bhlm' einsum (and tile the token dim / flash-style softmax).
    attn_out = jnp.zeros((B * L, H), jnp.float32)
    for h in range(NUM_HEADS):
        sl = slice(h * DH, (h + 1) * DH)
        qh = q3[:, :, sl].astype(jnp.bfloat16)
        kh = k3[:, :, sl].astype(jnp.bfloat16)
        vh = v3[:, :, sl].astype(jnp.bfloat16)
        s = jnp.einsum('bld,bmd->blm', qh, kh,
                       preferred_element_type=jnp.float32) * scale + addm3
        s = s - jnp.max(s, axis=-1, keepdims=True)
        p = jnp.exp(s)
        p = p * pl.reciprocal(jnp.sum(p, axis=-1, keepdims=True), approx=True)
        ctx_h = jnp.einsum('blm,bmd->bld', p.astype(jnp.bfloat16), vh,
                           preferred_element_type=jnp.float32)      # (B, L, DH)
        attn_out = attn_out + jnp.dot(
            ctx_h.reshape(B * L, DH).astype(jnp.bfloat16), wo[sl, :],
            preferred_element_type=jnp.float32)
    attn_out = attn_out + bo

    x1 = _layer_norm(x + attn_out, g1, be1)

    # ---- FFN (bf16 MXU, f32 accumulate, f32 GELU) ----------------------------
    h1 = jnp.dot(x1.astype(jnp.bfloat16), w_ff1_ref[0],
                 preferred_element_type=jnp.float32) + bf1
    h1 = _gelu(h1)
    ffn = jnp.dot(h1.astype(jnp.bfloat16), w_ff2_ref[0],
                  preferred_element_type=jnp.float32) + bf2
    x_out = _layer_norm(x1 + ffn, g2, be2)
    x_sc[...] = x_out                              # carry to next layer (VMEM only)

    # ---- pooler + proj_match head fused into the last layer step -------------
    @pl.when(l == last)
    def _head():
        cls = x_out.reshape(B, L, H)[:, 0, :]      # (B, H) [CLS] token
        hv = hvec_ref[...]                         # (2, OUT_PAD) f32
        bp = hv[0:1, :H]
        bm = hv[1:2, :]
        pooled = jnp.tanh(
            jnp.dot(cls.astype(jnp.bfloat16), wp_ref[...],
                    preferred_element_type=jnp.float32) + bp)
        # nn.Dropout is identity at inference time.
        score = jnp.dot(pooled.astype(jnp.bfloat16), wm_ref[...],
                        preferred_element_type=jnp.float32) + bm    # (B, OUT_PAD)
        score_ref[...] = score.astype(score_ref.dtype)


# ---------------- wrapper ------------------------------------------------------
def embed(params, ids):
    # Glue: gather word + position embeddings, then embedding layernorm.
    x = params['word_emb'][ids] + params['pos_emb'][None, :, :]
    return _layer_norm(x, params['ln_emb_g'], params['ln_emb_b'])


def stance_forward(params, inp_tensor, msk_tensor):
    x0 = embed(params, inp_tensor).astype(jnp.float32).reshape(B * L, H)
    addm = (1.0 - msk_tensor.astype(jnp.float32)) * -1e9           # (B, L)

    stk = params['stacked']
    args = (x0, addm, stk['w_attn'], stk['w_ff1'], stk['w_ff2'], stk['vecs'],
            stk['wp'], stk['wm_pad'], stk['hvec'])

    # Rough cost hint for XLA scheduling around the custom call.
    flops = NUM_LAYERS * (4 * 2 * (B * L) * H * H
                          + 2 * 2 * B * L * L * H
                          + 2 * 2 * (B * L) * H * FF) \
        + 2 * B * H * H + 2 * B * H * OUT_PAD
    transcendentals = NUM_LAYERS * (B * NUM_HEADS * L * L + B * L * FF) + B * H
    bytes_accessed = sum(int(a.size) * a.dtype.itemsize for a in args) \
        + B * OUT_PAD * 4

    score_pad = pl.pallas_call(
        fused_encoder_head_kernel,
        out_shape=jax.ShapeDtypeStruct((B, OUT_PAD), jnp.float32),
        grid_spec=pltpu.PrefetchScalarGridSpec(
            num_scalar_prefetch=0,
            grid=(NUM_LAYERS,),
            in_specs=[
                pl.BlockSpec((B * L, H), lambda l: (0, 0)),            # x0
                pl.BlockSpec((B, L), lambda l: (0, 0)),                # additive mask
                pl.BlockSpec((1, 4, H, H), lambda l: (l, 0, 0, 0)),    # wq/wk/wv/wo (bf16)
                pl.BlockSpec((1, H, FF), lambda l: (l, 0, 0)),         # w1 (bf16)
                pl.BlockSpec((1, FF, H), lambda l: (l, 0, 0)),         # w2 (bf16)
                pl.BlockSpec((1, NUM_VECS, FF), lambda l: (l, 0, 0)),  # packed biases/LN
                pl.BlockSpec((H, H), lambda l: (0, 0)),                # pooler weight (bf16)
                pl.BlockSpec((H, OUT_PAD), lambda l: (0, 0)),          # proj_match weight, padded
                pl.BlockSpec((2, OUT_PAD), lambda l: (0, 0)),          # pooler/proj biases
            ],
            out_specs=pl.BlockSpec((B, OUT_PAD), lambda l: (0, 0)),
            scratch_shapes=[pltpu.VMEM((B * L, H), jnp.float32)],      # resident activations
        ),
        compiler_params=pltpu.CompilerParams(
            # layer axis carries the resident activation -> must be arbitrary.
            # TODO(synk): at production shapes add a "parallel" token-tile axis
            # (megacore on v7x) and tile M in 128-512 row blocks.
            dimension_semantics=("arbitrary",),
            # explicit budget: v7x has only 64 MiB physical VMEM.
            vmem_limit_bytes=48 * 1024 * 1024,
        ),
        cost_estimate=pl.CostEstimate(
            flops=flops, transcendentals=transcendentals,
            bytes_accessed=bytes_accessed),
    )(*args)

    score = score_pad[:, :NUM_LABELS]             # drop lane padding
    if NUM_LABELS == 1:                           # torch .squeeze(-1)
        score = score[..., 0]
    return score


# ---------------- pure-JAX reference (same mixed precision as the kernel) -----
def reference_forward(params, inp_tensor, msk_tensor):
    bf = jnp.bfloat16
    x = embed(params, inp_tensor).astype(jnp.float32).reshape(B * L, H)
    addm = ((1.0 - msk_tensor.astype(jnp.float32)) * -1e9)[:, None, :]  # (B,1,L)
    scale = 1.0 / math.sqrt(DH)
    for lp in params['layers']:
        xb = x.astype(bf)
        q = jnp.dot(xb, lp['wq'].astype(bf), preferred_element_type=jnp.float32) + lp['bq']
        k = jnp.dot(xb, lp['wk'].astype(bf), preferred_element_type=jnp.float32) + lp['bk']
        v = jnp.dot(xb, lp['wv'].astype(bf), preferred_element_type=jnp.float32) + lp['bv']
        q3, k3, v3 = q.reshape(B, L, H), k.reshape(B, L, H), v.reshape(B, L, H)
        attn_out = jnp.zeros((B * L, H), jnp.float32)
        for h in range(NUM_HEADS):
            sl = slice(h * DH, (h + 1) * DH)
            s = jnp.einsum('bld,bmd->blm', q3[:, :, sl].astype(bf),
                           k3[:, :, sl].astype(bf),
                           preferred_element_type=jnp.float32) * scale + addm
            s = s - jnp.max(s, axis=-1, keepdims=True)
            p = jnp.exp(s)
            p = p / jnp.sum(p, axis=-1, keepdims=True)
            ctx = jnp.einsum('blm,bmd->bld', p.astype(bf), v3[:, :, sl].astype(bf),
                             preferred_element_type=jnp.float32)
            attn_out = attn_out + jnp.dot(ctx.reshape(B * L, DH).astype(bf),
                                          lp['wo'].astype(bf)[sl, :],
                                          preferred_element_type=jnp.float32)
        attn_out = attn_out + lp['bo']
        x1 = _layer_norm(x + attn_out, lp['g1'], lp['be1'])
        h1 = _gelu(jnp.dot(x1.astype(bf), lp['w1'].astype(bf),
                           preferred_element_type=jnp.float32) + lp['bf1'])
        ffn = jnp.dot(h1.astype(bf), lp['w2'].astype(bf),
                      preferred_element_type=jnp.float32) + lp['bf2']
        x = _layer_norm(x1 + ffn, lp['g2'], lp['be2'])
    cls = x.reshape(B, L, H)[:, 0, :]
    pooled = jnp.tanh(jnp.dot(cls.astype(bf), params['wp'].astype(bf),
                              preferred_element_type=jnp.float32) + params['bp'])
    score = jnp.dot(pooled.astype(bf), params['wm'].astype(bf),
                    preferred_element_type=jnp.float32) + params['bm']
    if NUM_LABELS == 1:
        score = score[..., 0]
    return score


# ---------------- parameter init + packing -------------------------------------
def pack_params(params):
    """Stack per-layer weights with a leading layer axis (bf16) and pack all
    tiny bias / LayerNorm vectors into a single f32 buffer."""
    layers = params['layers']
    w_attn = jnp.stack(
        [jnp.stack([lp['wq'], lp['wk'], lp['wv'], lp['wo']]) for lp in layers]
    ).astype(jnp.bfloat16)                                        # (NL, 4, H, H)
    w_ff1 = jnp.stack([lp['w1'] for lp in layers]).astype(jnp.bfloat16)   # (NL, H, FF)
    w_ff2 = jnp.stack([lp['w2'] for lp in layers]).astype(jnp.bfloat16)   # (NL, FF, H)

    def pad_ff(v):   # (1, n) -> (1, FF)
        return jnp.pad(v, ((0, 0), (0, FF - v.shape[-1])))

    keys = ('bq', 'bk', 'bv', 'bo', 'g1', 'be1', 'bf1', 'bf2', 'g2', 'be2')
    vecs = jnp.stack([jnp.concatenate([pad_ff(lp[k]) for k in keys], axis=0)
                      for lp in layers])                          # (NL, NUM_VECS, FF) f32

    wp = params['wp'].astype(jnp.bfloat16)                        # (H, H)
    wm_pad = jnp.zeros((H, OUT_PAD), jnp.float32)
    wm_pad = wm_pad.at[:, :NUM_LABELS].set(params['wm']).astype(jnp.bfloat16)
    hvec = jnp.zeros((2, OUT_PAD), jnp.float32)
    hvec = hvec.at[0, :H].set(params['bp'][0])
    hvec = hvec.at[1, :NUM_LABELS].set(params['bm'][0])
    return dict(w_attn=w_attn, w_ff1=w_ff1, w_ff2=w_ff2, vecs=vecs,
                wp=wp, wm_pad=wm_pad, hvec=hvec)


def init_params(key):
    # TODO(synk): synthetic deterministic weights; no pretrained RoBERTa checkpoint.
    def nrm(k, shape, std=0.02):
        return std * jax.random.normal(k, shape, dtype=jnp.float32)

    keys = jax.random.split(key, 8 + NUM_LAYERS)
    params = {
        'word_emb': nrm(keys[0], (VOCAB, H)),
        'pos_emb': nrm(keys[1], (L, H)),
        'ln_emb_g': jnp.ones((1, H), jnp.float32),
        'ln_emb_b': jnp.zeros((1, H), jnp.float32),
        'wp': nrm(keys[2], (H, H)),
        'bp': jnp.zeros((1, H), jnp.float32),
        'wm': nrm(keys[3], (H, NUM_LABELS)),       # proj_match: Linear(H, num_labels)
        'bm': jnp.zeros((1, NUM_LABELS), jnp.float32),
        'layers': [],
    }
    for li in range(NUM_LAYERS):
        lk = jax.random.split(keys[8 + li], 6)
        params['layers'].append({
            'wq': nrm(lk[0], (H, H)), 'bq': jnp.zeros((1, H), jnp.float32),
            'wk': nrm(lk[1], (H, H)), 'bk': jnp.zeros((1, H), jnp.float32),
            'wv': nrm(lk[2], (H, H)), 'bv': jnp.zeros((1, H), jnp.float32),
            'wo': nrm(lk[3], (H, H)), 'bo': jnp.zeros((1, H), jnp.float32),
            'g1': jnp.ones((1, H), jnp.float32), 'be1': jnp.zeros((1, H), jnp.float32),
            'w1': nrm(lk[4], (H, FF)), 'bf1': jnp.zeros((1, FF), jnp.float32),
            'w2': nrm(lk[5], (FF, H)), 'bf2': jnp.zeros((1, H), jnp.float32),
            'g2': jnp.ones((1, H), jnp.float32), 'be2': jnp.zeros((1, H), jnp.float32),
        })
    params['stacked'] = pack_params(params)
    return params


# ---------------- main ----------------------------------------------------------
if __name__ == "__main__":
    root = jax.random.PRNGKey(0)
    k_par, k_ids = jax.random.split(root)
    params = init_params(k_par)

    # inp_tensor: token ids, msk_tensor: attention mask (1 = valid).
    inp_tensor = jax.random.randint(k_ids, (B, L), 0, VOCAB, dtype=jnp.int32)
    msk_tensor = jnp.array([[1] * L, [1] * 5 + [0] * (L - 5)], dtype=jnp.float32)

    score = stance_forward(params, inp_tensor, msk_tensor)
    jax.block_until_ready(score)

    ref = reference_forward(params, inp_tensor, msk_tensor)
    assert score.shape == ((B,) if NUM_LABELS == 1 else (B, NUM_LABELS))
    # Tolerance covers the approx-reciprocal softmax normalization in the kernel.
    assert jnp.allclose(score, ref, atol=1e-3, rtol=1e-2), (score, ref)

    print("KERNEL_OK")
</pallas_src>

<mosaic_0001>
module attributes {stable_mosaic.version = 11 : i64} {
  func.func @fused_encoder_head_kernel(%arg0: i32, %arg1: memref<16x32xf32, #tpu.memory_space<vmem>>, %arg2: memref<2x8xf32, #tpu.memory_space<vmem>>, %arg3: memref<1x4x32x32xbf16, #tpu.memory_space<vmem>>, %arg4: memref<1x32x64xbf16, #tpu.memory_space<vmem>>, %arg5: memref<1x64x32xbf16, #tpu.memory_space<vmem>>, %arg6: memref<1x10x64xf32, #tpu.memory_space<vmem>>, %arg7: memref<32x32xbf16, #tpu.memory_space<vmem>>, %arg8: memref<32x128xbf16, #tpu.memory_space<vmem>>, %arg9: memref<2x128xf32, #tpu.memory_space<vmem>>, %arg10: memref<2x128xf32, #tpu.memory_space<vmem>>, %arg11: memref<16x32xf32, #tpu.memory_space<vmem>>) attributes {dimension_semantics = [#tpu.dimension_semantics<arbitrary>], iteration_bounds = array<i64: 2>, scalar_prefetch = 0 : i64, scratch_operands = 1 : i64, tpu.core_type = #tpu.core_type<tc>, window_params = [{pipeline_mode = #tpu.pipeline_mode<synchronous>, transform_indices = @transform_0, window_bounds = array<i64: 16, 32>}, {pipeline_mode = #tpu.pipeline_mode<synchronous>, transform_indices = @transform_1, window_bounds = array<i64: 2, 8>}, {transform_indices = @transform_2, window_bounds = array<i64: 1, 4, 32, 32>}, {transform_indices = @transform_3, window_bounds = array<i64: 1, 32, 64>}, {transform_indices = @transform_4, window_bounds = array<i64: 1, 64, 32>}, {transform_indices = @transform_5, window_bounds = array<i64: 1, 10, 64>}, {pipeline_mode = #tpu.pipeline_mode<synchronous>, transform_indices = @transform_6, window_bounds = array<i64: 32, 32>}, {pipeline_mode = #tpu.pipeline_mode<synchronous>, transform_indices = @transform_7, window_bounds = array<i64: 32, 128>}, {pipeline_mode = #tpu.pipeline_mode<synchronous>, transform_indices = @transform_8, window_bounds = array<i64: 2, 128>}, {pipeline_mode = #tpu.pipeline_mode<synchronous>, transform_indices = @transform_9, window_bounds = array<i64: 2, 128>}]} {
    %c0_i32 = arith.constant 0 : i32
    %0 = arith.cmpi eq, %arg0, %c0_i32 : i32
    %1 = arith.extui %0 : i1 to i32
    %c0_i32_0 = arith.constant 0 : i32
    %2 = arith.cmpi ne, %1, %c0_i32_0 : i32
    scf.if %2 {
      %c0_60 = arith.constant 0 : index
      %c0_61 = arith.constant 0 : index
      %173 = vector.load %arg1[%c0_60, %c0_61] : memref<16x32xf32, #tpu.memory_space<vmem>>, vector<16x32xf32>
      %c0_62 = arith.constant 0 : index
      %c0_63 = arith.constant 0 : index
      %174 = vector.load %arg11[%c0_62, %c0_63] : memref<16x32xf32, #tpu.memory_space<vmem>>, vector<16x32xf32>
      tpu.vector_store %arg11[%c0_62, %c0_63], %173 {strides = array<i32>} : memref<16x32xf32, #tpu.memory_space<vmem>>, vector<16x32xf32>,
      %cst_64 = arith.constant 0.000000e+00 : f32
      %175 = vector.broadcast %cst_64 : f32 to vector<2x128xf32>
      %c0_65 = arith.constant 0 : index
      %c0_66 = arith.constant 0 : index
      %176 = vector.load %arg10[%c0_65, %c0_66] : memref<2x128xf32, #tpu.memory_space<vmem>>, vector<2x128xf32>
      tpu.vector_store %arg10[%c0_65, %c0_66], %175 {strides = array<i32>} : memref<2x128xf32, #tpu.memory_space<vmem>>, vector<2x128xf32>,
    } else {
    }
    %c0 = arith.constant 0 : index
    %c0_1 = arith.constant 0 : index
    %3 = vector.load %arg11[%c0, %c0_1] : memref<16x32xf32, #tpu.memory_space<vmem>>, vector<16x32xf32>
    %c0_2 = arith.constant 0 : index
    %c0_3 = arith.constant 0 : index
    %4 = vector.load %arg2[%c0_2, %c0_3] : memref<2x8xf32, #tpu.memory_space<vmem>>, vector<2x8xf32>
    %c0_4 = arith.constant 0 : index
    %c0_5 = arith.constant 0 : index
    %c0_6 = arith.constant 0 : index
    %5 = vector.load %arg6[%c0_4, %c0_5, %c0_6] : memref<1x10x64xf32, #tpu.memory_space<vmem>>, vector<1x10x64xf32>
    %6 = vector.shape_cast %5 : vector<1x10x64xf32> to vector<10x64xf32>
    %7 = vector.extract_strided_slice %6 {offsets = [0, 0], sizes = [1, 32], strides = [1, 1]} : vector<10x64xf32> to vector<1x32xf32>
    %8 = vector.extract_strided_slice %6 {offsets = [1, 0], sizes = [1, 32], strides = [1, 1]} : vector<10x64xf32> to vector<1x32xf32>
    %9 = vector.extract_strided_slice %6 {offsets = [2, 0], sizes = [1, 32], strides = [1, 1]} : vector<10x64xf32> to vector<1x32xf32>
    %10 = vector.extract_strided_slice %6 {offsets = [3, 0], sizes = [1, 32], strides = [1, 1]} : vector<10x64xf32> to vector<1x32xf32>
    %11 = vector.extract_strided_slice %6 {offsets = [4, 0], sizes = [1, 32], strides = [1, 1]} : vector<10x64xf32> to vector<1x32xf32>
    %12 = vector.extract_strided_slice %6 {offsets = [5, 0], sizes = [1, 32], strides = [1, 1]} : vector<10x64xf32> to vector<1x32xf32>
    %13 = vector.extract_strided_slice %6 {offsets = [6, 0], sizes = [1, 64], strides = [1, 1]} : vector<10x64xf32> to vector<1x64xf32>
    %14 = vector.extract_strided_slice %6 {offsets = [7, 0], sizes = [1, 32], strides = [1, 1]} : vector<10x64xf32> to vector<1x32xf32>
    %15 = vector.extract_strided_slice %6 {offsets = [8, 0], sizes = [1, 32], strides = [1, 1]} : vector<10x64xf32> to vector<1x32xf32>
    %16 = vector.extract_strided_slice %6 {offsets = [9, 0], sizes = [1, 32], strides = [1, 1]} : vector<10x64xf32> to vector<1x32xf32>
    %17 = arith.truncf %3 : vector<16x32xf32> to vector<16x32xbf16>
    %c0_7 = arith.constant 0 : index
    %c0_8 = arith.constant 0 : index
    %c0_9 = arith.constant 0 : index
    %c0_10 = arith.constant 0 : index
    %18 = vector.load %arg3[%c0_7, %c0_8, %c0_9, %c0_10] : memref<1x4x32x32xbf16, #tpu.memory_space<vmem>>, vector<1x1x32x32xbf16>
    %19 = vector.shape_cast %18 : vector<1x1x32x32xbf16> to vector<32x32xbf16>
    %c0_11 = arith.constant 0 : index
    %c1 = arith.constant 1 : index
    %c0_12 = arith.constant 0 : index
    %c0_13 = arith.constant 0 : index
    %20 = vector.load %arg3[%c0_11, %c1, %c0_12, %c0_13] : memref<1x4x32x32xbf16, #tpu.memory_space<vmem>>, vector<1x1x32x32xbf16>
    %21 = vector.shape_cast %20 : vector<1x1x32x32xbf16> to vector<32x32xbf16>
    %c0_14 = arith.constant 0 : index
    %c2 = arith.constant 2 : index
    %c0_15 = arith.constant 0 : index
    %c0_16 = arith.constant 0 : index
    %22 = vector.load %arg3[%c0_14, %c2, %c0_15, %c0_16] : memref<1x4x32x32xbf16, #tpu.memory_space<vmem>>, vector<1x1x32x32xbf16>
    %23 = vector.shape_cast %22 : vector<1x1x32x32xbf16> to vector<32x32xbf16>
    %c0_17 = arith.constant 0 : index
    %c3 = arith.constant 3 : index
    %c0_18 = arith.constant 0 : index
    %c0_19 = arith.constant 0 : index
    %24 = vector.load %arg3[%c0_17, %c3, %c0_18, %c0_19] : memref<1x4x32x32xbf16, #tpu.memory_space<vmem>>, vector<1x1x32x32xbf16>
    %25 = vector.shape_cast %24 : vector<1x1x32x32xbf16> to vector<32x32xbf16>
    %cst = arith.constant dense<0.000000e+00> : vector<16x32xf32>
    %26 = tpu.matmul %17, %19, %cst {dimension_numbers = #tpu.dot_dimension_numbers<[1], [0], [0], [1], [0, 0, 1, 1], [], []>} : vector<16x32xbf16>, vector<32x32xbf16>, vector<16x32xf32> -> vector<16x32xf32>
    %27 = vector.broadcast %7 : vector<1x32xf32> to vector<16x32xf32>
    %28 = arith.addf %26, %27 : vector<16x32xf32>
    %cst_20 = arith.constant dense<0.000000e+00> : vector<16x32xf32>
    %29 = tpu.matmul %17, %21, %cst_20 {dimension_numbers = #tpu.dot_dimension_numbers<[1], [0], [0], [1], [0, 0, 1, 1], [], []>} : vector<16x32xbf16>, vector<32x32xbf16>, vector<16x32xf32> -> vector<16x32xf32>
    %30 = vector.broadcast %8 : vector<1x32xf32> to vector<16x32xf32>
    %31 = arith.addf %29, %30 : vector<16x32xf32>
    %cst_21 = arith.constant dense<0.000000e+00> : vector<16x32xf32>
    %32 = tpu.matmul %17, %23, %cst_21 {dimension_numbers = #tpu.dot_dimension_numbers<[1], [0], [0], [1], [0, 0, 1, 1], [], []>} : vector<16x32xbf16>, vector<32x32xbf16>, vector<16x32xf32> -> vector<16x32xf32>
    %33 = vector.broadcast %9 : vector<1x32xf32> to vector<16x32xf32>
    %34 = arith.addf %32, %33 : vector<16x32xf32>
    %35 = vector.shape_cast %28 : vector<16x32xf32> to vector<2x8x32xf32>
    %36 = vector.shape_cast %31 : vector<16x32xf32> to vector<2x8x32xf32>
    %37 = vector.shape_cast %34 : vector<16x32xf32> to vector<2x8x32xf32>
    %38 = vector.shape_cast %4 : vector<2x8xf32> to vector<2x1x8xf32>
    %cst_22 = arith.constant 0.000000e+00 : f32
    %39 = vector.broadcast %cst_22 : f32 to vector<16x32xf32>
    %40 = vector.extract_strided_slice %35 {offsets = [0, 0, 0], sizes = [2, 8, 16], strides = [1, 1, 1]} : vector<2x8x32xf32> to vector<2x8x16xf32>
    %41 = arith.truncf %40 : vector<2x8x16xf32> to vector<2x8x16xbf16>
    %42 = vector.extract_strided_slice %36 {offsets = [0, 0, 0], sizes = [2, 8, 16], strides = [1, 1, 1]} : vector<2x8x32xf32> to vector<2x8x16xf32>
    %43 = arith.truncf %42 : vector<2x8x16xf32> to vector<2x8x16xbf16>
    %44 = vector.extract_strided_slice %37 {offsets = [0, 0, 0], sizes = [2, 8, 16], strides = [1, 1, 1]} : vector<2x8x32xf32> to vector<2x8x16xf32>
    %45 = arith.truncf %44 : vector<2x8x16xf32> to vector<2x8x16xbf16>
    "tpu.trace_start"() <{level = 10 : i32, message = "bld,bmd->blm"}> : () -> ()
    %cst_23 = arith.constant dense<0.000000e+00> : vector<2x8x8xf32>
    %46 = tpu.matmul %41, %43, %cst_23 {dimension_numbers = #tpu.dot_dimension_numbers<[2], [2], [1], [1], [0, 0, 0, 1, 1, 1], [0], [0]>} : vector<2x8x16xbf16>, vector<2x8x16xbf16>, vector<2x8x8xf32> -> vector<2x8x8xf32>
    "tpu.trace_stop"() : () -> ()
    %cst_24 = arith.constant 2.500000e-01 : f32
    %47 = vector.broadcast %cst_24 : f32 to vector<2x8x8xf32>
    %48 = arith.mulf %46, %47 : vector<2x8x8xf32>
    %49 = vector.broadcast %38 : vector<2x1x8xf32> to vector<2x8x8xf32>
    %50 = arith.addf %48, %49 : vector<2x8x8xf32>
    %cst_25 = arith.constant dense<0xFF800000> : vector<2x8xf32>
    %51 = vector.multi_reduction <maximumf>, %50, %cst_25 [2] : vector<2x8x8xf32> to vector<2x8xf32>
    %52 = vector.shape_cast %51 : vector<2x8xf32> to vector<2x8x1xf32>
    %53 = vector.broadcast %52 : vector<2x8x1xf32> to vector<2x8x8xf32>
    %54 = arith.subf %50, %53 : vector<2x8x8xf32>
    %55 = math.exp %54 : vector<2x8x8xf32>
    %cst_26 = arith.constant dense<0.000000e+00> : vector<2x8xf32>
    %56 = vector.multi_reduction <add>, %55, %cst_26 [2] : vector<2x8x8xf32> to vector<2x8xf32>
    %57 = vector.shape_cast %56 : vector<2x8xf32> to vector<2x8x1xf32>
    %58 = tpu.reciprocal %57 {approx = true} : vector<2x8x1xf32> -> vector<2x8x1xf32>
    %59 = vector.broadcast %58 : vector<2x8x1xf32> to vector<2x8x8xf32>
    %60 = arith.mulf %55, %59 : vector<2x8x8xf32>
    %61 = arith.truncf %60 : vector<2x8x8xf32> to vector<2x8x8xbf16>
    "tpu.trace_start"() <{level = 10 : i32, message = "blm,bmd->bld"}> : () -> ()
    %cst_27 = arith.constant dense<0.000000e+00> : vector<2x8x16xf32>
    %62 = tpu.matmul %61, %45, %cst_27 {dimension_numbers = #tpu.dot_dimension_numbers<[2], [1], [1], [2], [0, 0, 0, 1, 1, 2], [0], [0]>} : vector<2x8x8xbf16>, vector<2x8x16xbf16>, vector<2x8x16xf32> -> vector<2x8x16xf32>
    "tpu.trace_stop"() : () -> ()
    %63 = vector.shape_cast %62 : vector<2x8x16xf32> to vector<16x16xf32>
    %64 = arith.truncf %63 : vector<16x16xf32> to vector<16x16xbf16>
    %65 = vector.extract_strided_slice %25 {offsets = [0, 0], sizes = [16, 32], strides = [1, 1]} : vector<32x32xbf16> to vector<16x32xbf16>
    %cst_28 = arith.constant dense<0.000000e+00> : vector<16x32xf32>
    %66 = tpu.matmul %64, %65, %cst_28 {dimension_numbers = #tpu.dot_dimension_numbers<[1], [0], [0], [1], [0, 0, 1, 1], [], []>} : vector<16x16xbf16>, vector<16x32xbf16>, vector<16x32xf32> -> vector<16x32xf32>
    %67 = arith.addf %39, %66 : vector<16x32xf32>
    %68 = vector.extract_strided_slice %35 {offsets = [0, 0, 16], sizes = [2, 8, 16], strides = [1, 1, 1]} : vector<2x8x32xf32> to vector<2x8x16xf32>
    %69 = arith.truncf %68 : vector<2x8x16xf32> to vector<2x8x16xbf16>
    %70 = vector.extract_strided_slice %36 {offsets = [0, 0, 16], sizes = [2, 8, 16], strides = [1, 1, 1]} : vector<2x8x32xf32> to vector<2x8x16xf32>
    %71 = arith.truncf %70 : vector<2x8x16xf32> to vector<2x8x16xbf16>
    %72 = vector.extract_strided_slice %37 {offsets = [0, 0, 16], sizes = [2, 8, 16], strides = [1, 1, 1]} : vector<2x8x32xf32> to vector<2x8x16xf32>
    %73 = arith.truncf %72 : vector<2x8x16xf32> to vector<2x8x16xbf16>
    "tpu.trace_start"() <{level = 10 : i32, message = "bld,bmd->blm"}> : () -> ()
    %cst_29 = arith.constant dense<0.000000e+00> : vector<2x8x8xf32>
    %74 = tpu.matmul %69, %71, %cst_29 {dimension_numbers = #tpu.dot_dimension_numbers<[2], [2], [1], [1], [0, 0, 0, 1, 1, 1], [0], [0]>} : vector<2x8x16xbf16>, vector<2x8x16xbf16>, vector<2x8x8xf32> -> vector<2x8x8xf32>
    "tpu.trace_stop"() : () -> ()
    %cst_30 = arith.constant 2.500000e-01 : f32
    %75 = vector.broadcast %cst_30 : f32 to vector<2x8x8xf32>
    %76 = arith.mulf %74, %75 : vector<2x8x8xf32>
    %77 = vector.broadcast %38 : vector<2x1x8xf32> to vector<2x8x8xf32>
    %78 = arith.addf %76, %77 : vector<2x8x8xf32>
    %cst_31 = arith.constant dense<0xFF800000> : vector<2x8xf32>
    %79 = vector.multi_reduction <maximumf>, %78, %cst_31 [2] : vector<2x8x8xf32> to vector<2x8xf32>
    %80 = vector.shape_cast %79 : vector<2x8xf32> to vector<2x8x1xf32>
    %81 = vector.broadcast %80 : vector<2x8x1xf32> to vector<2x8x8xf32>
    %82 = arith.subf %78, %81 : vector<2x8x8xf32>
    %83 = math.exp %82 : vector<2x8x8xf32>
    %cst_32 = arith.constant dense<0.000000e+00> : vector<2x8xf32>
    %84 = vector.multi_reduction <add>, %83, %cst_32 [2] : vector<2x8x8xf32> to vector<2x8xf32>
    %85 = vector.shape_cast %84 : vector<2x8xf32> to vector<2x8x1xf32>
    %86 = tpu.reciprocal %85 {approx = true} : vector<2x8x1xf32> -> vector<2x8x1xf32>
    %87 = vector.broadcast %86 : vector<2x8x1xf32> to vector<2x8x8xf32>
    %88 = arith.mulf %83, %87 : vector<2x8x8xf32>
    %89 = arith.truncf %88 : vector<2x8x8xf32> to vector<2x8x8xbf16>
    "tpu.trace_start"() <{level = 10 : i32, message = "blm,bmd->bld"}> : () -> ()
    %cst_33 = arith.constant dense<0.000000e+00> : vector<2x8x16xf32>
    %90 = tpu.matmul %89, %73, %cst_33 {dimension_numbers = #tpu.dot_dimension_numbers<[2], [1], [1], [2], [0, 0, 0, 1, 1, 2], [0], [0]>} : vector<2x8x8xbf16>, vector<2x8x16xbf16>, vector<2x8x16xf32> -> vector<2x8x16xf32>
    "tpu.trace_stop"() : () -> ()
    %91 = vector.shape_cast %90 : vector<2x8x16xf32> to vector<16x16xf32>
    %92 = arith.truncf %91 : vector<16x16xf32> to vector<16x16xbf16>
    %93 = vector.extract_strided_slice %25 {offsets = [16, 0], sizes = [16, 32], strides = [1, 1]} : vector<32x32xbf16> to vector<16x32xbf16>
    %cst_34 = arith.constant dense<0.000000e+00> : vector<16x32xf32>
    %94 = tpu.matmul %92, %93, %cst_34 {dimension_numbers = #tpu.dot_dimension_numbers<[1], [0], [0], [1], [0, 0, 1, 1], [], []>} : vector<16x16xbf16>, vector<16x32xbf16>, vector<16x32xf32> -> vector<16x32xf32>
    %95 = arith.addf %67, %94 : vector<16x32xf32>
    %96 = vector.broadcast %10 : vector<1x32xf32> to vector<16x32xf32>
    %97 = arith.addf %95, %96 : vector<16x32xf32>
    %98 = arith.addf %3, %97 : vector<16x32xf32>
    %cst_35 = arith.constant dense<0.000000e+00> : vector<16xf32>
    %99 = vector.multi_reduction <add>, %98, %cst_35 [1] : vector<16x32xf32> to vector<16xf32>
    %100 = vector.shape_cast %99 : vector<16xf32> to vector<16x1xf32>
    %cst_36 = arith.constant 3.200000e+01 : f32
    %101 = vector.broadcast %cst_36 : f32 to vector<16x1xf32>
    %102 = arith.divf %100, %101 : vector<16x1xf32>
    %103 = vector.broadcast %102 : vector<16x1xf32> to vector<16x32xf32>
    %104 = arith.subf %98, %103 : vector<16x32xf32>
    %105 = arith.mulf %104, %104 : vector<16x32xf32>
    %cst_37 = arith.constant dense<0.000000e+00> : vector<16xf32>
    %106 = vector.multi_reduction <add>, %105, %cst_37 [1] : vector<16x32xf32> to vector<16xf32>
    %107 = vector.shape_cast %106 : vector<16xf32> to vector<16x1xf32>
    %cst_38 = arith.constant 3.200000e+01 : f32
    %108 = vector.broadcast %cst_38 : f32 to vector<16x1xf32>
    %109 = arith.divf %107, %108 : vector<16x1xf32>
    %110 = vector.broadcast %102 : vector<16x1xf32> to vector<16x32xf32>
    %111 = arith.subf %98, %110 : vector<16x32xf32>
    %cst_39 = arith.constant 9.99999974E-6 : f32
    %112 = vector.broadcast %cst_39 : f32 to vector<16x1xf32>
    %113 = arith.addf %109, %112 : vector<16x1xf32>
    %114 = math.rsqrt %113 : vector<16x1xf32>
    %115 = vector.broadcast %114 : vector<16x1xf32> to vector<16x32xf32>
    %116 = arith.mulf %111, %115 : vector<16x32xf32>
    %117 = vector.broadcast %11 : vector<1x32xf32> to vector<16x32xf32>
    %118 = arith.mulf %116, %117 : vector<16x32xf32>
    %119 = vector.broadcast %12 : vector<1x32xf32> to vector<16x32xf32>
    %120 = arith.addf %118, %119 : vector<16x32xf32>
    %121 = arith.truncf %120 : vector<16x32xf32> to vector<16x32xbf16>
    %c0_40 = arith.constant 0 : index
    %c0_41 = arith.constant 0 : index
    %c0_42 = arith.constant 0 : index
    %122 = vector.load %arg4[%c0_40, %c0_41, %c0_42] : memref<1x32x64xbf16, #tpu.memory_space<vmem>>, vector<1x32x64xbf16>
    %123 = vector.shape_cast %122 : vector<1x32x64xbf16> to vector<32x64xbf16>
    %cst_43 = arith.constant dense<0.000000e+00> : vector<16x64xf32>
    %124 = tpu.matmul %121, %123, %cst_43 {dimension_numbers = #tpu.dot_dimension_numbers<[1], [0], [0], [1], [0, 0, 1, 1], [], []>} : vector<16x32xbf16>, vector<32x64xbf16>, vector<16x64xf32> -> vector<16x64xf32>
    %125 = vector.broadcast %13 : vector<1x64xf32> to vector<16x64xf32>
    %126 = arith.addf %124, %125 : vector<16x64xf32>
    %cst_44 = arith.constant 5.000000e-01 : f32
    %127 = vector.broadcast %cst_44 : f32 to vector<16x64xf32>
    %128 = arith.mulf %127, %126 : vector<16x64xf32>
    %cst_45 = arith.constant 4.471500e-02 : f32
    %129 = vector.broadcast %cst_45 : f32 to vector<16x64xf32>
    %130 = arith.mulf %129, %126 : vector<16x64xf32>
    %131 = arith.mulf %130, %126 : vector<16x64xf32>
    %132 = arith.mulf %131, %126 : vector<16x64xf32>
    %133 = arith.addf %126, %132 : vector<16x64xf32>
    %cst_46 = arith.constant 0.797884583 : f32
    %134 = vector.broadcast %cst_46 : f32 to vector<16x64xf32>
    %135 = arith.mulf %134, %133 : vector<16x64xf32>
    %136 = math.tanh %135 : vector<16x64xf32>
    %cst_47 = arith.constant 1.000000e+00 : f32
    %137 = vector.broadcast %cst_47 : f32 to vector<16x64xf32>
    %138 = arith.addf %137, %136 : vector<16x64xf32>
    %139 = arith.mulf %128, %138 : vector<16x64xf32>
    %140 = arith.truncf %139 : vector<16x64xf32> to vector<16x64xbf16>
    %c0_48 = arith.constant 0 : index
    %c0_49 = arith.constant 0 : index
    %c0_50 = arith.constant 0 : index
    %141 = vector.load %arg5[%c0_48, %c0_49, %c0_50] : memref<1x64x32xbf16, #tpu.memory_space<vmem>>, vector<1x64x32xbf16>
    %142 = vector.shape_cast %141 : vector<1x64x32xbf16> to vector<64x32xbf16>
    %cst_51 = arith.constant dense<0.000000e+00> : vector<16x32xf32>
    %143 = tpu.matmul %140, %142, %cst_51 {dimension_numbers = #tpu.dot_dimension_numbers<[1], [0], [0], [1], [0, 0, 1, 1], [], []>} : vector<16x64xbf16>, vector<64x32xbf16>, vector<16x32xf32> -> vector<16x32xf32>
    %144 = vector.broadcast %14 : vector<1x32xf32> to vector<16x32xf32>
    %145 = arith.addf %143, %144 : vector<16x32xf32>
    %146 = arith.addf %120, %145 : vector<16x32xf32>
    %cst_52 = arith.constant dense<0.000000e+00> : vector<16xf32>
    %147 = vector.multi_reduction <add>, %146, %cst_52 [1] : vector<16x32xf32> to vector<16xf32>
    %148 = vector.shape_cast %147 : vector<16xf32> to vector<16x1xf32>
    %cst_53 = arith.constant 3.200000e+01 : f32
    %149 = vector.broadcast %cst_53 : f32 to vector<16x1xf32>
    %150 = arith.divf %148, %149 : vector<16x1xf32>
    %151 = vector.broadcast %150 : vector<16x1xf32> to vector<16x32xf32>
    %152 = arith.subf %146, %151 : vector<16x32xf32>
    %153 = arith.mulf %152, %152 : vector<16x32xf32>
    %cst_54 = arith.constant dense<0.000000e+00> : vector<16xf32>
    %154 = vector.multi_reduction <add>, %153, %cst_54 [1] : vector<16x32xf32> to vector<16xf32>
    %155 = vector.shape_cast %154 : vector<16xf32> to vector<16x1xf32>
    %cst_55 = arith.constant 3.200000e+01 : f32
    %156 = vector.broadcast %cst_55 : f32 to vector<16x1xf32>
    %157 = arith.divf %155, %156 : vector<16x1xf32>
    %158 = vector.broadcast %150 : vector<16x1xf32> to vector<16x32xf32>
    %159 = arith.subf %146, %158 : vector<16x32xf32>
    %cst_56 = arith.constant 9.99999974E-6 : f32
    %160 = vector.broadcast %cst_56 : f32 to vector<16x1xf32>
    %161 = arith.addf %157, %160 : vector<16x1xf32>
    %162 = math.rsqrt %161 : vector<16x1xf32>
    %163 = vector.broadcast %162 : vector<16x1xf32> to vector<16x32xf32>
    %164 = arith.mulf %159, %163 : vector<16x32xf32>
    %165 = vector.broadcast %15 : vector<1x32xf32> to vector<16x32xf32>
    %166 = arith.mulf %164, %165 : vector<16x32xf32>
    %167 = vector.broadcast %16 : vector<1x32xf32> to vector<16x32xf32>
    %168 = arith.addf %166, %167 : vector<16x32xf32>
    %c0_57 = arith.constant 0 : index
    %c0_58 = arith.constant 0 : index
    %169 = vector.load %arg11[%c0_57, %c0_58] : memref<16x32xf32, #tpu.memory_space<vmem>>, vector<16x32xf32>
    tpu.vector_store %arg11[%c0_57, %c0_58], %168 {strides = array<i32>} : memref<16x32xf32, #tpu.memory_space<vmem>>, vector<16x32xf32>,
    %c1_i32 = arith.constant 1 : i32
    %170 = arith.cmpi eq, %arg0, %c1_i32 : i32
    %171 = arith.extui %170 : i1 to i32
    %c0_i32_59 = arith.constant 0 : i32
    %172 = arith.cmpi ne, %171, %c0_i32_59 : i32
    scf.if %172 {
      %173 = vector.shape_cast %168 : vector<16x32xf32> to vector<2x8x32xf32>
      %174 = vector.extract_strided_slice %173 {offsets = [0, 0, 0], sizes = [2, 1, 32], strides = [1, 1, 1]} : vector<2x8x32xf32> to vector<2x1x32xf32>
      %175 = vector.shape_cast %174 : vector<2x1x32xf32> to vector<2x32xf32>
      %c0_60 = arith.constant 0 : index
      %c0_61 = arith.constant 0 : index
      %176 = vector.load %arg9[%c0_60, %c0_61] : memref<2x128xf32, #tpu.memory_space<vmem>>, vector<2x128xf32>
      %177 = vector.extract_strided_slice %176 {offsets = [0, 0], sizes = [1, 32], strides = [1, 1]} : vector<2x128xf32> to vector<1x32xf32>
      %178 = vector.extract_strided_slice %176 {offsets = [1, 0], sizes = [1, 128], strides = [1, 1]} : vector<2x128xf32> to vector<1x128xf32>
      %179 = arith.truncf %175 : vector<2x32xf32> to vector<2x32xbf16>
      %c0_62 = arith.constant 0 : index
      %c0_63 = arith.constant 0 : index
      %180 = vector.load %arg7[%c0_62, %c0_63] : memref<32x32xbf16, #tpu.memory_space<vmem>>, vector<32x32xbf16>
      %cst_64 = arith.constant dense<0.000000e+00> : vector<2x32xf32>
      %181 = tpu.matmul %179, %180, %cst_64 {dimension_numbers = #tpu.dot_dimension_numbers<[1], [0], [0], [1], [0, 0, 1, 1], [], []>} : vector<2x32xbf16>, vector<32x32xbf16>, vector<2x32xf32> -> vector<2x32xf32>
      %182 = vector.broadcast %177 : vector<1x32xf32> to vector<2x32xf32>
      %183 = arith.addf %181, %182 : vector<2x32xf32>
      %184 = math.tanh %183 : vector<2x32xf32>
      %185 = arith.truncf %184 : vector<2x32xf32> to vector<2x32xbf16>
      %c0_65 = arith.constant 0 : index
      %c0_66 = arith.constant 0 : index
      %186 = vector.load %arg8[%c0_65, %c0_66] : memref<32x128xbf16, #tpu.memory_space<vmem>>, vector<32x128xbf16>
      %cst_67 = arith.constant dense<0.000000e+00> : vector<2x128xf32>
      %187 = tpu.matmul %185, %186, %cst_67 {dimension_numbers = #tpu.dot_dimension_numbers<[1], [0], [0], [1], [0, 0, 1, 1], [], []>} : vector<2x32xbf16>, vector<32x128xbf16>, vector<2x128xf32> -> vector<2x128xf32>
      %188 = vector.broadcast %178 : vector<1x128xf32> to vector<2x128xf32>
      %189 = arith.addf %187, %188 : vector<2x128xf32>
      %c0_68 = arith.constant 0 : index
      %c0_69 = arith.constant 0 : index
      %190 = vector.load %arg10[%c0_68, %c0_69] : memref<2x128xf32, #tpu.memory_space<vmem>>, vector<2x128xf32>
      tpu.vector_store %arg10[%c0_68, %c0_69], %189 {strides = array<i32>} : memref<2x128xf32, #tpu.memory_space<vmem>>, vector<2x128xf32>,
    } else {
    }
    return
  }
  func.func @transform_0(%arg0: i32) -> (i32, i32) {
    %c0_i32 = arith.constant 0 : i32
    %c0_i32_0 = arith.constant 0 : i32
    %c0_i32_1 = arith.constant 0 : i32
    return %c0_i32, %c0_i32_0 : i32, i32
  }
  func.func @transform_1(%arg0: i32) -> (i32, i32) {
    %c0_i32 = arith.constant 0 : i32
    %c0_i32_0 = arith.constant 0 : i32
    %c0_i32_1 = arith.constant 0 : i32
    return %c0_i32, %c0_i32_0 : i32, i32
  }
  func.func @transform_2(%arg0: i32) -> (i32, i32, i32, i32) {
    %c0_i32 = arith.constant 0 : i32
    %c0_i32_0 = arith.constant 0 : i32
    %c0_i32_1 = arith.constant 0 : i32
    %c0_i32_2 = arith.constant 0 : i32
    return %arg0, %c0_i32, %c0_i32_0, %c0_i32_1 : i32, i32, i32, i32
  }
  func.func @transform_3(%arg0: i32) -> (i32, i32, i32) {
    %c0_i32 = arith.constant 0 : i32
    %c0_i32_0 = arith.constant 0 : i32
    %c0_i32_1 = arith.constant 0 : i32
    return %arg0, %c0_i32, %c0_i32_0 : i32, i32, i32
  }
  func.func @transform_4(%arg0: i32) -> (i32, i32, i32) {
    %c0_i32 = arith.constant 0 : i32
    %c0_i32_0 = arith.constant 0 : i32
    %c0_i32_1 = arith.constant 0 : i32
    return %arg0, %c0_i32, %c0_i32_0 : i32, i32, i32
  }
  func.func @transform_5(%arg0: i32) -> (i32, i32, i32) {
    %c0_i32 = arith.constant 0 : i32
    %c0_i32_0 = arith.constant 0 : i32
    %c0_i32_1 = arith.constant 0 : i32
    return %arg0, %c0_i32, %c0_i32_0 : i32, i32, i32
  }
  func.func @transform_6(%arg0: i32) -> (i32, i32) {
    %c0_i32 = arith.constant 0 : i32
    %c0_i32_0 = arith.constant 0 : i32
    %c0_i32_1 = arith.constant 0 : i32
    return %c0_i32, %c0_i32_0 : i32, i32
  }
  func.func @transform_7(%arg0: i32) -> (i32, i32) {
    %c0_i32 = arith.constant 0 : i32
    %c0_i32_0 = arith.constant 0 : i32
    %c0_i32_1 = arith.constant 0 : i32
    return %c0_i32, %c0_i32_0 : i32, i32
  }
  func.func @transform_8(%arg0: i32) -> (i32, i32) {
    %c0_i32 = arith.constant 0 : i32
    %c0_i32_0 = arith.constant 0 : i32
    %c0_i32_1 = arith.constant 0 : i32
    return %c0_i32, %c0_i32_0 : i32, i32
  }
  func.func @transform_9(%arg0: i32) -> (i32, i32) {
    %c0_i32 = arith.constant 0 : i32
    %c0_i32_0 = arith.constant 0 : i32
    %c0_i32_1 = arith.constant 0 : i32
    return %c0_i32, %c0_i32_0 : i32, i32
  }
}

</mosaic_0001>

<bundles_post_ra>
// kernel: tpu_custom_call.1
= control target key start
LH: loop header
LB: loop body
LE: loop exit
PB: predicated region body
PF: predicated region fallthrough
CT: control target
= control target key end

     0   :  { %14 = vsyncpa [#allocation4], 0  ;;  %s1990_s0 = inlined_call_operand.vmem [shape: f32[16,32], index: 0, kind: input, shape index: {}]   ;;  %s1991_s1 = inlined_call_operand.vmem [shape: f32[2,8], index: 1, kind: input, shape index: {}]   ;;  %s1992_s2 = inlined_call_operand.vmem [shape: bf16[2,4,32,32], index: 2, kind: input, shape index: {}]   ;;  %s1993_s3 = inlined_call_operand.hbm [shape: bf16[2,32,64], index: 3, kind: input, shape index: {}]   ;;  %s1994_s4 = inlined_call_operand.vmem [shape: bf16[2,64,32], index: 4, kind: input, shape index: {}]   ;;  %s1995_s5 = inlined_call_operand.vmem [shape: f32[2,10,64], index: 5, kind: input, shape index: {}]   ;;  %s1996_s6 = inlined_call_operand.hbm [shape: bf16[32,32], index: 6, kind: input, shape index: {}]   ;;  %s1997_s7 = inlined_call_operand.hbm [shape: bf16[32,128], index: 7, kind: input, shape index: {}]   ;;  %s1998_s8 = inlined_call_operand.vmem [shape: f32[2,128], index: 8, kind: input, shape index: {}]   ;;  %s1999_s9 = inlined_call_operand.hbm [shape: f32[2,128], index: 9, kind: output, shape index: {}]  }
   0x1   :  { %16 = vsyncpa [#allocation4 + $0x1], 0 }
   0x2   :  { %17 = vsyncpa [#allocation7], 0 }
   0x3   :  { %18 = vsyncpa [#allocation5], 0  ;;  %s1746_s30 = smov 0   ;;  %s1748_s10 = smov 0  }
   0x4   :  { %s1750_s11 = smov 0   ;;  %s1752_s12 = smov 0  }
   0x5 LB: > { %s1765_s13 = sadd.s32 4294967295, %s1686_s12   ;;  %p112_p0 = scmp.ne.s32.totalorder %s1678_s10, %s1674_s30  ;;  %s1686_s12 = sphi %s1752_s12, %s2012_s12   ;;  %s1682_s11 = sphi %s1750_s11, %s2011_s11   ;;  %s1678_s10 = sphi %s1748_s10, %s2010_s10   ;;  %s1674_s30 = sphi %s1746_s30, %s2009_s30  }
   0x6   : > { %p113_p1 = scmp.eq.s32.totalorder %s1765_s13, 0  ;;  %p1276_p2 = scmp.ge.s32.totalorder %s1686_s12, 1 }
   0x7   : > { %p259_p3 = scmp.lt.s32.totalorder %s1686_s12, 3  ;;  %p1277_p4 = scmp.ne.s32.totalorder %s1765_s13, 0 }
   0x8   : > { %p1774_p5 = por %p113_p1, %p112_p0  ;;  %s276_s17 = sshll.u32 %s1996_s6, 4  ;;  %s277_s17 = int_to_ptr.hbm [resolvable:$true] %s276_s17 }
   0x9   : > { %p1781_p6 = pnand %p1276_p2, %p259_p3  ;;  %s1688_s19 = smov [#allocation6]  }
   0xa   : > { %s278_s20 = sshll.u32 %s1688_s19, 4  ;;  %s290_s23 = sshll.u32 %s1997_s7, 4  ;;  %s279_s20 = int_to_ptr.vmem [resolvable:$true] %s278_s20  ;;  %s291_s23 = int_to_ptr.hbm [resolvable:$true] %s290_s23 }
   0xb   : > { %p1436_p7 = pneg %p1781_p6  ;;  %s2000_s24 = smov 64  }
   0xc   : > { %s2001_s25 = smov 4   ;;  %s1691_s26 = smov [#allocation8]  }
   0xd   : > { %p1437_p8 = pnand %p1436_p7, %p113_p1  ;;  %s292_s27 = sshll.u32 %s1691_s26, 4  ;;  %s293_s27 = int_to_ptr.vmem [resolvable:$true] %s292_s27 }
   0xe   : > { %s1799_s28 = sadd.s32 1, %s1686_s12   ;;  %s99_s29 = sadd.s32 1, %s1682_s11 }
   0xf   : > { %1439 = dma.hbm_to_vmem [thread:$0]  (!%p1437_p8), %s277_s17, 256, %s279_s20, [#allocation7], %s2000_s24, %s2000_s24, %s2001_s25  }
  0x10   : > { %1442 = dma.hbm_to_vmem [thread:$0]  (!%p1437_p8), %s291_s23, 256, %s293_s27, [#allocation7], %s2000_s24, %s2000_s24, %s2001_s25  }
  0x11   : > { %s96_s30 = ssub.s32 %s1686_s12, %s1799_s28  ;;  %p106_p9 = scmp.ne.s32.totalorder %s1682_s11, %s1678_s10 }
  0x12   : > { %p97_p10 = scmp.eq.s32.totalorder %s96_s30, 0  ;;  %p107_p11 = scmp.eq.s32.totalorder %s1686_s12, 0 }
  0x13   : > { %s317_s15 = sand.u32 1, %s1682_s11   ;;  %p1449_p13 = scmp.lt.s32.totalorder %s1686_s12, 2 }
  0x14   : > { %s1809_s16 = scalar_select %p97_p10, %s1682_s11, %s99_s29  }
  0x15   : > { %p108_p12 = por %p107_p11, %p106_p9  ;;  %s1280_s17 = sshll.u32 %s317_s15, 4 }
  0x16   : > { %s1400_s19 = sshll.u32 %s1686_s12, 4  ;;  %s321_s26 = scalar_lea.vmem [#allocation3], %s1280_s17 }
  0x17   : > { %s326_s22 = scalar_lea.hbm %s1993_s3, %s1400_s19  ;;  %s329_s27 = sshll.u32 %s321_s26, 4  ;;  %s330_s27 = int_to_ptr.vmem [resolvable:$true] %s329_s27 }
  0x18   : > { %s327_s23 = sshll.u32 %s326_s22, 4  ;;  %p1816_p0 = pnand %p1449_p13, %p108_p12  ;;  %s328_s23 = int_to_ptr.hbm [resolvable:$true] %s327_s23 }
  0x19   : > { %s318_s29 = scalar_lea.sflag [#allocation4], %s317_s15  ;;  %s1586_s30 = sshra.s32 %s328_s23, 4  ;;  %s1587_s30 = int_to_ptr.hbm [resolvable:$true] %s1586_s30 }
  0x1a   : > { %s1588_s25 = scalar_lea.hbm %s1587_s30, 16  ;;  %p1590_p3 = pneg %p1816_p0 }
  0x1b   : > { %p1589_p2 = scmp.ne.s32.totalorder %s1587_s30, %s1588_s25  ;;  %s1593_s17 = scalar_lea.hbm %s1993_s3, 32 }
  0x1c   : > { %p1594_p9 = scmp.lt.s32.totalorder %s1587_s30, %s1993_s3  ;;  %p1595_p10 = scmp.lt.s32.totalorder %s1593_s17, %s1588_s25 }
  0x1d   : > { %p1591_p7 = pnand %p1590_p3, %p1589_p2 }
  0x1e   : > { %p1596_p11 = por %p1595_p10, %p1594_p9 }
  0x1f   : > { %p1592_p8 = pneg %p1591_p7 }
  0x21   : > { %p1597_p12 = pnand %p1596_p11, %p1592_p8 }
  0x23   : > { %1600 = shalt.err (!%p1597_p12)
}
  0x24   : > { %s2005_s15 = smov 4   ;;  %s2006_s22 = smov 64  }
  0x25   : > { %1446 = dma.hbm_to_vmem [thread:$0]  (!%p1816_p0), %s328_s23, 256, %s330_s27, %s318_s29, %s2006_s22, %s2006_s22, %s2005_s15  }
  0x26   : > { %357 = sbr.rel (%p1781_p6) target bundleno = 2131 (0x853), region = 56  ;;  %s359_s26 = sand.u32 (!%p1781_p6), 1, %s1678_s10  }
  0x27   : > { %s1836_s12 = sshll.u32 (!%p1781_p6), %s359_s26, 4  ;;  %s360_s30 = scalar_lea.sflag (!%p1781_p6), [#allocation4], %s359_s26 }
  0x2b   : > { %1661 = dma.done.wait (%p1774_p5), %s360_s30, 256  }
  0x2c   : > { %1663 = vsyncadd (%p1774_p5), %s360_s30, 4294967040 }
  0x2d   : > { %1665 = dma.done.wait (%p113_p1), [#allocation7], 512  }
  0x2e   : > { %1667 = vsyncadd (%p113_p1), [#allocation7], 4294966784  ;;  %p419_p6 = scmp.lt.s32.totalorder %s1765_s13, 1 }
  0x30   : > { %s420_s18 = scalar_select %p419_p6, %s1765_s13, 1 }
  0x31   : > { %438 = sbr.rel (%p1277_p4) target bundleno = 58 (0x3a), region = 72 }
  0x32   : > { %s1401_s24 = sshll.u32 %s420_s18, 6  ;;  %s1402_s23 = sshll.u32 %s420_s18, 5 }
  0x33   : > { %s1852_s19 = scalar_lea.vmem %s1992_s2, %s1401_s24  ;;  %s1857_s20 = scalar_lea.vmem %s1994_s4, %s1402_s23 }
  0x34   : > { %s1403_s21 = sshll.u32 %s420_s18, 4 }
  0x35   : > { %s1862_s26 = scalar_lea.vmem %s1995_s5, %s1403_s21 }
  0x36   : > { %v439_v0 = vld [vmem:[%s1990_s0] sm:$0xff]  ;;  %vm441_vm0 = vcmask 261120   ;;  %v440_v1 = vld [vmem:[%s1990_s0 + $0x8] sm:$0xff]  ;;  %v1692_v2 = vmov 0.0  }
  0x37   : > { %442 = vst.msk [vmem:[#allocation2] sm:$0xff] %vm441_vm0, %v439_v0 }
  0x38   : > { %443 = vst.msk [vmem:[#allocation2 + $0x8] sm:$0xff] %vm441_vm0, %v440_v1 }
  0x39   : > { %444 = vst [vmem:[#allocation9] sm:$0x3] %v1692_v2 }
  0x3a PF: > { %v1405_v3 = vld [vmem:[%s1852_s19 + $0x8] sm:$0xff]  ;;  %v1407_v4 = vld [vmem:[%s1852_s19 + $0x18] sm:$0xff]  ;;  %v1404_v5 = vld [vmem:[%s1852_s19] sm:$0xff]  ;;  %vm483_vm1 = vcmask 261120   ;;  %vm563_vm2 = vcmask 130048   ;;  %s1693_s25 = smov 112  }
  0x3b   : > { %493 = vmatpush.bf16.msra.mxu0 %v1405_v3  ;;  %520 = vmatpush.bf16.msra.mxu1 %v1407_v4  ;;  %v1406_v6 = vld [vmem:[%s1852_s19 + $0x10] sm:$0xff]  ;;  %v1885_v10 = vld [vmem:[%s1862_s26] sm:$0xff]  ;;  %v1409_v37 = vld [vmem:[%s1852_s19 + $0x28] sm:$0xff]  ;;  %vm610_vm3 = vcmask 64512   ;;  %vm638_vm4 = vcmask 1043456   ;;  %s2007_s29 = scalar_lea.vmem [#allocation3], %s1836_s12 }
  0x3c   : > { %v470_v11 = vperm.slane %v1885_v10, 0  ;;  %v501_v12 = vperm.slane %v1885_v10, 1  ;;  %547 = vmatpush.bf16.msra.mxu2 %v1409_v37  ;;  %v1408_v39 = vld [vmem:[%s1852_s19 + $0x20] sm:$0xff]  ;;  %vm1005_vm12 = vcmask 523264   ;;  %p1377_p1 = scmp.ne.s32.totalorder %s1765_s13, 1 }
  0x3d   : > { %v447_v42 = vld [vmem:[%s1991_s1] sm:$0x3] }
  0x3e   : > { %v1876_v7 = vld [vmem:[#allocation2] sm:$0xff]  ;;  %v556_v44 = vrot.slane %v447_v42, 1  ;;  %v604_v52 = vperm.slane %v447_v42, 0 }
  0x3f   : > { %v1878_v8 = vld [vmem:[#allocation2 + $0x8] sm:$0xff]  ;;  %494 = vmatpush.bf16.msra.mxu0 %v1404_v5  ;;  %521 = vmatpush.bf16.msra.mxu1 %v1406_v6 }
  0x40   : > { %v450_v9 = vpack.c.bf16 %v1878_v8, %v1876_v7  ;;  %548 = vmatpush.bf16.msra.mxu2 %v1408_v39  ;;  %v605_v46 = vperm.slane %v556_v44, 0 }
  0x42   : > { %1314 = vmatmul.msk.bf16.vlgmr.msra.gmra.mxu0 %vm483_vm1, %v450_v9  ;;  %1323 = vmatmul.msk.bf16.vlgmr.msra.gmra.mxu1 %vm483_vm1, %v450_v9 }
  0x43   : > { %1332 = vmatmul.msk.bf16.vlgmr.msra.gmra.mxu2 %vm483_vm1, %v450_v9 }
  0xbf   : > { %v496_v13 = vpop.f32.mrf.mxu0  ;;  %v523_v14 = vpop.f32.mrf.mxu1 }
  0xc0   : > { %v497_v15 = vadd.f32 %v496_v13, %v470_v11  ;;  %v524_v16 = vadd.f32 %v523_v14, %v501_v12 }
  0xc2   : > { %v557_v17 = vpack.c.bf16 %v497_v15, %v497_v15  ;;  %v559_v18 = vpack.c.bf16 %v524_v16, %v524_v16  ;;  %v528_v16 = vperm.slane %v1885_v10, 2 }
  0xc4   : > { %v568_v19 = vsel %vm563_vm2, %v559_v18, 0  ;;  %v681_v20 = vunpack.c.l.b16 %v559_v18  ;;  %v676_v21 = vunpack.c.l.b16 %v557_v17 }
  0xc5   : > { %577 = vmatpush.bf16.xpose.msra.mxu3 %v568_v19 }
  0xc6   : > { %v682_v22 = vpack.c.b16 %v681_v20, %v681_v20  ;;  %v677_v23 = vpack.c.b16 %v676_v21, %v676_v21 }
  0xc7   : > { %v498_v24 = vpop.f32.mrf.mxu0  ;;  %v525_v25 = vpop.f32.mrf.mxu1 }
  0xc8   : > { %v499_v26 = vadd.f32 %v498_v24, %v470_v11  ;;  %v526_v27 = vadd.f32 %v525_v25, %v501_v12  ;;  %683 = vrot.lane.b32.xlu0 %v682_v22, %s1693_s25  ;;  %678 = vrot.lane.b32.xlu1 %v677_v23, %s1693_s25 }
  0xca   : > { %v558_v28 = vpack.c.bf16 %v499_v26, %v499_v26  ;;  %v560_v29 = vpack.c.bf16 %v526_v27, %v526_v27 }
  0xcc   : > { %v705_v30 = vunpack.c.l.b16 %v558_v28  ;;  %v710_v31 = vunpack.c.l.b16 %v560_v29  ;;  %1333 = vmatmul.msk.bf16.vlgmr.msra.gmra.mxu3 %vm563_vm2, %v557_v17  ;;  %v587_v32 = vsel %vm563_vm2, %v560_v29, 0  ;;  %v550_v17 = vpop.f32.mrf.mxu2 }
  0xcd   : > { %596 = vmatpush.bf16.xpose.msrb.mxu0 %v587_v32  ;;  %v551_v18 = vadd.f32 %v550_v17, %v528_v16 }
  0xce   : > { %v706_v33 = vpack.c.b16 %v705_v30, %v705_v30  ;;  %v711_v34 = vpack.c.b16 %v710_v31, %v710_v31 }
  0xcf   : > { %v561_v19 = vpack.c.bf16 %v551_v18, %v551_v18 }
  0xd0   : > { %712 = vrot.lane.b32.xlu0 %v711_v34, %s1693_s25  ;;  %707 = vrot.lane.b32.xlu1 %v706_v33, %s1693_s25 }
  0xd1   : > { %v762_v20 = vunpack.c.l.b16 %v561_v19  ;;  %v640_v23 = vsel %vm638_vm4, %v561_v19, 0 }
  0xd2   : > { %649 = vmatpush.bf16.msrb.mxu1 %v640_v23  ;;  %v1694_v23 = vmov 32.0  }
  0xd3   : > { %v763_v21 = vpack.c.b16 %v762_v20, %v762_v20 }
  0xd4   : > { %1334 = vmatmul.msk.bf16.vlgmr.msrb.gmra.mxu0 %vm563_vm2, %v558_v28  ;;  %v552_v22 = vpop.f32.mrf.mxu2 }
  0xd5   : > { %v553_v24 = vadd.f32 %v552_v22, %v528_v16 }
  0xd7   : > { %v562_v25 = vpack.c.bf16 %v553_v24, %v553_v24 }
  0xd9   : > { %v659_v27 = vsel %vm638_vm4, %v562_v25, 0 }
  0xda   : > { %668 = vmatpush.bf16.msrb.mxu2 %v659_v27 }
 0x13a   : > { %v684_v35 = vpop.permute.xlu0 %683  ;;  %v679_v38 = vpop.permute.xlu1 %678 }
 0x13b   : > { %v689_v36 = vsel %vm563_vm2, %v684_v35, 0 }
 0x13c   : > { %698 = vmatpush.bf16.xpose.msrb.mxu3 %v689_v36 }
 0x142   : > { %v713_v40 = vpop.permute.xlu0 %712  ;;  %v708_v43 = vpop.permute.xlu1 %707 }
 0x143   : > { %v718_v41 = vsel %vm563_vm2, %v713_v40, 0  ;;  %1337 = vmatmul.msk.bf16.vlgmr.msrb.gmra.mxu3 %vm563_vm2, %v679_v38 }
 0x144   : > { %727 = vmatpush.bf16.xpose.msra.mxu0 %v718_v41 }
 0x14b   : > { %1338 = vmatmul.msk.bf16.vlgmr.msra.gmra.mxu0 %vm563_vm2, %v708_v43 }
 0x14f   : > { %v579_v45 = vpop.f32.mrf.mxu3 }
 0x150   : > { %v602_v50 = vmul.f32 0.25, %v579_v45  ;;  %v786_v45 = vunpack.c.l.b16 %v562_v25 }
 0x151   : > { %v598_v47 = vpop.f32.mrf.mxu0 }
 0x152   : > { %v603_v48 = vmul.f32 0.25, %v598_v47  ;;  %v608_v55 = vadd.f32 %v604_v52, %v602_v50 }
 0x154   : > { %v609_v49 = vadd.f32 %v605_v46, %v603_v48  ;;  %v611_v56 = vsel %vm610_vm3, %v608_v55, -inf }
 0x156   : > { %v614_v51 = vsel %vm610_vm3, %v609_v49, -inf }
 0x157   : > { %615 = vmax.xlane.f32.xlu2 %v614_v51  ;;  %v581_v53 = vpop.f32.mrf.mxu3 }
 0x158   : > { %v1410_v53 = vld [vmem:[%s1852_s19 + $0x30] sm:$0xff] }
 0x159   : > { %v600_v54 = vpop.f32.mrf.mxu0  ;;  %849 = vmatpush.bf16.msrb.mxu0 %v1410_v53 }
 0x15f   : > { %612 = vmax.xlane.f32.xlu2 %v611_v56 }
 0x1c6   : > { %v700_v57 = vpop.f32.mrf.mxu3 }
 0x1c7   : > { %v733_v58 = vmul.f32 0.25, %v700_v57 }
 0x1c8   : > { %v729_v59 = vpop.f32.mrf.mxu0 }
 0x1c9   : > { %v734_v60 = vmul.f32 0.25, %v729_v59  ;;  %v735_v61 = vadd.f32 %v733_v58, %v604_v52 }
 0x1ca   : > { %v616_v62 = vpop.xlane.xlu2 %615 }
 0x1cb   : > { %v737_v63 = vsel %vm610_vm3, %v735_v61, -inf  ;;  %v736_v0 = vadd.f32 %v734_v60, %v605_v46  ;;  %v618_v6 = vsub.f32 %v609_v49, %v616_v62  ;;  %v787_v46 = vpack.c.b16 %v786_v45, %v786_v45 }
 0x1cc   : > { %738 = vmax.xlane.f32.xlu1 %v737_v63 }
 0x1cd   : > { %v740_v1 = vsel %vm610_vm3, %v736_v0, -inf  ;;  %v621_v11 = vmul.f32 1.442695, %v618_v6 }
 0x1ce   : > { %741 = vmax.xlane.f32.xlu0 %v740_v1  ;;  %v702_v2 = vpop.f32.mrf.mxu3  ;;  %v1411_v1 = vld [vmem:[%s1852_s19 + $0x38] sm:$0xff]  ;;  %s2008_s19 = smov %s2007_s29 }
 0x1cf   : > { %826 = vmatpush.bf16.msra.mxu3 %v1411_v1 }
 0x1d0   : > { %v731_v3 = vpop.f32.mrf.mxu0 }
 0x1d2   : > { %v613_v4 = vpop.xlane.xlu2 %612 }
 0x1d3   : > { %v617_v5 = vsub.f32 %v608_v55, %v613_v4 }
 0x1d5   : > { %v619_v9 = vmul.f32 1.442695, %v617_v5 }
 0x1d7   : > { %1494 = vpow2.f32 %v619_v9 }
 0x1d8   : > { %1496 = vpow2.f32 %v621_v11  ;;  %v856_v11 = vperm.slane %v1885_v10, 3 }
 0x1dd   : > { %v1495_v12 = vpop.eup %1494 }
 0x1de   : > { %v623_v13 = vsel %vm610_vm3, %v1495_v12, 0.0  ;;  %v1497_v14 = vpop.eup %1496 }
 0x1df   : > { %624 = vadd.xlane.f32.xlu2 %v623_v13  ;;  %v626_v15 = vsel %vm610_vm3, %v1497_v14, 0.0 }
 0x1e2   : > { %764 = vrot.lane.b32.xlu0 %v763_v21, %s1693_s25 }
 0x1e7   : > { %627 = vadd.xlane.f32.xlu2 %v626_v15 }
 0x23f   : > { %v739_v26 = vpop.xlane.xlu1 %738 }
 0x240   : > { %v743_v28 = vsub.f32 %v735_v61, %v739_v26 }
 0x241   : > { %v742_v29 = vpop.xlane.xlu0 %741 }
 0x242   : > { %v745_v30 = vmul.f32 1.442695, %v743_v28  ;;  %v744_v31 = vsub.f32 %v736_v0, %v742_v29 }
 0x244   : > { %1498 = vpow2.f32 %v745_v30  ;;  %v747_v32 = vmul.f32 1.442695, %v744_v31 }
 0x246   : > { %1500 = vpow2.f32 %v747_v32 }
 0x24a   : > { %v1499_v33 = vpop.eup %1498 }
 0x24b   : > { %v749_v34 = vsel %vm610_vm3, %v1499_v33, 0.0 }
 0x24c   : > { %750 = vadd.xlane.f32.xlu2 %v749_v34  ;;  %v1501_v35 = vpop.eup %1500 }
 0x24d   : > { %v752_v37 = vsel %vm610_vm3, %v1501_v35, 0.0 }
 0x252   : > { %v625_v36 = vpop.xlane.xlu2 %624 }
 0x253   : > { %1502 = vrcp.f32 %v625_v36 }
 0x254   : > { %753 = vadd.xlane.f32.xlu2 %v752_v37  ;;  %v765_v47 = vpop.permute.xlu0 %764 }
 0x255   : > { %v770_v48 = vsel %vm638_vm4, %v765_v47, 0 }
 0x256   : > { %779 = vmatpush.bf16.msra.mxu1 %v770_v48 }
 0x259   : > { %v1503_v38 = vpop.eup %1502 }
 0x25a   : > { %v631_v39 = vmul.f32 %v1503_v38, %v1495_v12  ;;  %v628_v40 = vpop.xlane.xlu2 %627  ;;  %v1413_v38 = vld [vmem:[%s2007_s29 + $0x8] sm:$0xff] }
 0x25b   : > { %1504 = vrcp.f32 %v628_v40 }
 0x25c   : > { %v633_v41 = vpack.c.bf16 %v631_v39, %v631_v39 }
 0x25e   : > { %1335 = vmatmul.msk.bf16.vlgmr.msrb.gmra.mxu1 %vm610_vm3, %v633_v41  ;;  %v1412_v41 = vld [vmem:[%s2008_s19] sm:$0xff] }
 0x25f   : > { %945 = vmatpush.bf16.msrb.mxu1 %v1413_v38 }
 0x261   : > { %v1505_v42 = vpop.eup %1504 }
 0x262   : > { %v632_v43 = vmul.f32 %v1505_v42, %v1497_v14 }
 0x263   : > { %946 = vmatpush.bf16.msrb.mxu1 %v1412_v41 }
 0x264   : > { %v634_v44 = vpack.c.bf16 %v632_v43, %v632_v43 }
 0x266   : > { %1336 = vmatmul.msk.bf16.vlgmr.msrb.gmra.mxu2 %vm610_vm3, %v634_v44 }
 0x26c   : > { %788 = vrot.lane.b32.xlu2 %v787_v46, %s1693_s25 }
 0x2bf   : > { %v751_v49 = vpop.xlane.xlu2 %750 }
 0x2c0   : > { %1506 = vrcp.f32 %v751_v49 }
 0x2c6   : > { %v1507_v50 = vpop.eup %1506 }
 0x2c7   : > { %v757_v51 = vmul.f32 %v1507_v50, %v1499_v33  ;;  %v754_v52 = vpop.xlane.xlu2 %753 }
 0x2c8   : > { %1508 = vrcp.f32 %v754_v52 }
 0x2c9   : > { %v759_v54 = vpack.c.bf16 %v757_v51, %v757_v51  ;;  %1510 = vrcp.f32 %v1694_v23 }
 0x2cb   : > { %1339 = vmatmul.msk.bf16.vlgmr.msra.gmra.mxu1 %vm610_vm3, %v759_v54 }
 0x2ce   : > { %v1509_v55 = vpop.eup %1508 }
 0x2cf   : > { %v758_v56 = vmul.f32 %v1509_v55, %v1501_v35  ;;  %v789_v57 = vpop.permute.xlu2 %788  ;;  %v1511_v24 = vpop.eup %1510 }
 0x2d0   : > { %v794_v58 = vsel %vm638_vm4, %v789_v57, 0  ;;  %v868_v25 = vmul.f32 32.0, %v1511_v24  ;;  %vm872_vm5 = vweird.f32 %v1511_v24 }
 0x2d1   : > { %v760_v59 = vpack.c.bf16 %v758_v56, %v758_v56  ;;  %803 = vmatpush.bf16.msra.mxu2 %v794_v58  ;;  %v912_v58 = vperm.slane %v1885_v10, 4 }
 0x2d2   : > { %v869_v26 = vsub.f32 1.0, %v868_v25 }
 0x2d4   : > { %1340 = vmatmul.msk.bf16.vlgmr.msra.gmra.mxu2 %vm610_vm3, %v760_v59  ;;  %v870_v27 = vmul.f32 %v1511_v24, %v869_v26 }
 0x2db   : > { %v651_v60 = vpop.f32.mrf.mxu1 }
 0x2e3   : > { %v653_v61 = vpop.f32.mrf.mxu1 }
 0x2e9   : > { %v670_v62 = vpop.f32.mrf.mxu2 }
 0x2ea   : > { %v674_v63 = vpack.c.bf16 %v670_v62, %v651_v60  ;;  %v915_v62 = vperm.slane %v1885_v10, 5 }
 0x2ec   : > { %1350 = vmatmul.msk.bf16.vlgmr.msrb.gmra.mxu0 %vm563_vm2, %v674_v63 }
 0x2f1   : > { %v672_v0 = vpop.f32.mrf.mxu2 }
 0x348   : > { %v781_v2 = vpop.f32.mrf.mxu1 }
 0x350   : > { %v783_v3 = vpop.f32.mrf.mxu1 }
 0x357   : > { %v805_v4 = vpop.f32.mrf.mxu2 }
 0x358   : > { %v809_v5 = vpack.c.bf16 %v805_v4, %v781_v2 }
 0x35a   : > { %1345 = vmatmul.msk.bf16.vlgmr.msra.gmra.mxu3 %vm563_vm2, %v809_v5  ;;  %v1417_v5 = vld [vmem:[%s1857_s20 + $0x18] sm:$0xff] }
 0x35b   : > { %1013 = vmatpush.bf16.msrb.mxu2 %v1417_v5 }
 0x35f   : > { %v807_v6 = vpop.f32.mrf.mxu2 }
 0x360   : > { %v1416_v6 = vld [vmem:[%s1857_s20 + $0x10] sm:$0xff] }
 0x361   : > { %1014 = vmatpush.bf16.msrb.mxu2 %v1416_v6 }
 0x369   : > { %v851_v9 = vpop.f32.mrf.mxu0 }
 0x371   : > { %v853_v17 = vpop.f32.mrf.mxu0 }
 0x3dd   : > { %v828_v12 = vpop.f32.mrf.mxu3 }
 0x3de   : > { %v852_v13 = vadd.f32 %v851_v9, %v828_v12  ;;  %v1415_v9 = vld [vmem:[%s1857_s20 + $0x8] sm:$0xff]  ;;  %v923_v12 = vperm.slane %v1885_v10, 6 }
 0x3df   : > { %1015 = vmatpush.bf16.msrb.mxu2 %v1415_v9 }
 0x3e0   : > { %v857_v14 = vadd.f32 %v856_v11, %v852_v13 }
 0x3e2   : > { %v859_v15 = vadd.f32 %v857_v14, %v1876_v7  ;;  %v871_v7 = vadd.f32 %v1511_v24, %v870_v27 }
 0x3e4   : > { %v861_v16 = vsel %vm483_vm1, %v859_v15, 0.0  ;;  %v1935_v28 = vsel %vm872_vm5, %v1511_v24, %v871_v7 }
 0x3e5   : > { %862 = vadd.xlane.f32.xlu1 %v861_v16  ;;  %v830_v18 = vpop.f32.mrf.mxu3 }
 0x3e6   : > { %v854_v19 = vadd.f32 %v853_v17, %v830_v18 }
 0x3e8   : > { %v858_v20 = vadd.f32 %v856_v11, %v854_v19  ;;  %v1414_v11 = vld [vmem:[%s1857_s20] sm:$0xff] }
 0x3e9   : > { %1016 = vmatpush.bf16.msrb.mxu2 %v1414_v11 }
 0x3ea   : > { %v860_v21 = vadd.f32 %v858_v20, %v1878_v8 }
 0x3ec   : > { %v864_v22 = vsel %vm483_vm1, %v860_v21, 0.0 }
 0x3ed   : > { %865 = vadd.xlane.f32.xlu1 %v864_v22 }
 0x458   : > { %v863_v29 = vpop.xlane.xlu1 %862 }
 0x459   : > { %v874_v30 = vmul.f32 %v1935_v28, %v863_v29 }
 0x45b   : > { %v876_v31 = vsub.f32 %v859_v15, %v874_v30 }
 0x45d   : > { %v878_v8 = vmul.f32 %v876_v31, %v876_v31 }
 0x45f   : > { %v880_v32 = vsel %vm483_vm1, %v878_v8, 0.0 }
 0x460   : > { %881 = vadd.xlane.f32.xlu2 %v880_v32  ;;  %v866_v33 = vpop.xlane.xlu1 %865 }
 0x461   : > { %v875_v34 = vmul.f32 %v1935_v28, %v866_v33 }
 0x463   : > { %v877_v35 = vsub.f32 %v860_v21, %v875_v34 }
 0x465   : > { %v879_v36 = vmul.f32 %v877_v35, %v877_v35 }
 0x467   : > { %v883_v37 = vsel %vm483_vm1, %v879_v36, 0.0 }
 0x468   : > { %884 = vadd.xlane.f32.xlu1 %v883_v37 }
 0x4d3   : > { %v882_v39 = vpop.xlane.xlu2 %881 }
 0x4d4   : > { %v886_v40 = vmul.f32 %v882_v39, %v1935_v28 }
 0x4d6   : > { %v888_v42 = vadd.f32 1e-05, %v886_v40 }
 0x4d8   : > { %1512 = vrsqrt.f32 %v888_v42  ;;  %vm896_vm7 = vweird.f32 %v888_v42 }
 0x4db   : > { %v885_v43 = vpop.xlane.xlu1 %884 }
 0x4dc   : > { %v887_v44 = vmul.f32 %v885_v43, %v1935_v28 }
 0x4de   : > { %v1513_v45 = vpop.eup %1512  ;;  %v889_v46 = vadd.f32 1e-05, %v887_v44 }
 0x4df   : > { %v891_v47 = vmul.f32 %v1513_v45, %v888_v42  ;;  %vm897_vm6 = vweird.f32 %v1513_v45 }
 0x4e0   : > { %1514 = vrsqrt.f32 %v889_v46  ;;  %vm898_vm8 = vmor %vm896_vm7, %vm897_vm6  ;;  %vm906_vm10 = vweird.f32 %v889_v46 }
 0x4e1   : > { %v892_v48 = vmul.f32 %v1513_v45, %v891_v47 }
 0x4e3   : > { %v893_v49 = vmul.f32 0.5, %v892_v48 }
 0x4e5   : > { %v894_v50 = vsub.f32 1.5, %v893_v49 }
 0x4e6   : > { %v1515_v51 = vpop.eup %1514 }
 0x4e7   : > { %v895_v52 = vmul.f32 %v1513_v45, %v894_v50  ;;  %v901_v53 = vmul.f32 %v1515_v51, %v889_v46  ;;  %vm907_vm9 = vweird.f32 %v1515_v51 }
 0x4e8   : > { %vm908_vm11 = vmor %vm906_vm10, %vm907_vm9 }
 0x4e9   : > { %v902_v54 = vmul.f32 %v1515_v51, %v901_v53  ;;  %v899_v55 = vsel %vm898_vm8, %v1513_v45, %v895_v52 }
 0x4ea   : > { %v910_v59 = vmul.f32 %v899_v55, %v876_v31 }
 0x4eb   : > { %v903_v56 = vmul.f32 0.5, %v902_v54 }
 0x4ec   : > { %v913_v63 = vmul.f32 %v912_v58, %v910_v59 }
 0x4ed   : > { %v904_v57 = vsub.f32 1.5, %v903_v56 }
 0x4ee   : > { %v916_v2 = vadd.f32 %v915_v62, %v913_v63  ;;  %v449_v63 = vld [vmem:[%s1862_s26 + $0x8] sm:$0x3] }
 0x4ef   : > { %v905_v60 = vmul.f32 %v1515_v51, %v904_v57  ;;  %v1072_v9 = vperm.slane %v449_v63, 1 }
 0x4f1   : > { %v909_v61 = vsel %vm908_vm11, %v1515_v51, %v905_v60 }
 0x4f2   : > { %v911_v0 = vmul.f32 %v909_v61, %v877_v35  ;;  %v980_v35 = vperm.slane %v1885_v10, 7 }
 0x4f4   : > { %v914_v1 = vmul.f32 %v912_v58, %v911_v0 }
 0x4f6   : > { %v917_v3 = vadd.f32 %v915_v62, %v914_v1 }
 0x4f8   : > { %v918_v4 = vpack.c.bf16 %v917_v3, %v916_v2 }
 0x4fa   : > { %1359 = vmatmul.msk.bf16.vlgmr.msrb.gmra.mxu1 %vm483_vm1, %v918_v4  ;;  %v1069_v4 = vperm.slane %v449_v63, 0 }
 0x577   : > { %v948_v13 = vpop.f32.mrf.mxu1 }
 0x578   : > { %v949_v14 = vadd.f32 %v948_v13, %v923_v12 }
 0x57a   : > { %v955_v15 = vmul.f32 0.044715, %v949_v14  ;;  %v953_v30 = vmul.f32 0.5, %v949_v14 }
 0x57c   : > { %v957_v16 = vmul.f32 %v955_v15, %v949_v14 }
 0x57e   : > { %v959_v17 = vmul.f32 %v957_v16, %v949_v14 }
 0x57f   : > { %v950_v18 = vpop.f32.mrf.mxu1 }
 0x580   : > { %v961_v19 = vadd.f32 %v959_v17, %v949_v14  ;;  %v951_v20 = vadd.f32 %v950_v18, %v923_v12 }
 0x582   : > { %v956_v21 = vmul.f32 0.044715, %v951_v20  ;;  %v963_v22 = vmul.f32 0.7978846, %v961_v19  ;;  %v954_v31 = vmul.f32 0.5, %v951_v20 }
 0x584   : > { %v958_v23 = vmul.f32 %v956_v21, %v951_v20  ;;  %1516 = vtanh.f32 %v963_v22 }
 0x586   : > { %v960_v24 = vmul.f32 %v958_v23, %v951_v20 }
 0x588   : > { %v962_v25 = vadd.f32 %v960_v24, %v951_v20 }
 0x58a   : > { %v964_v26 = vmul.f32 0.7978846, %v962_v25  ;;  %v1517_v27 = vpop.eup %1516 }
 0x58b   : > { %v967_v7 = vadd.f32 1.0, %v1517_v27 }
 0x58c   : > { %1518 = vtanh.f32 %v964_v26 }
 0x58d   : > { %v969_v32 = vmul.f32 %v967_v7, %v953_v30 }
 0x592   : > { %v1519_v29 = vpop.eup %1518 }
 0x593   : > { %v968_v8 = vadd.f32 1.0, %v1519_v29 }
 0x595   : > { %v970_v33 = vmul.f32 %v968_v8, %v954_v31 }
 0x597   : > { %v971_v34 = vpack.c.bf16 %v970_v33, %v969_v32 }
 0x599   : > { %1376 = vmatmul.msk.bf16.vlgmr.msrb.gmra.mxu2 %vm1005_vm12, %v971_v34 }
 0x61c   : > { %v1018_v36 = vpop.f32.mrf.mxu2 }
 0x61d   : > { %v1019_v37 = vadd.f32 %v1018_v36, %v980_v35 }
 0x61f   : > { %v1023_v38 = vadd.f32 %v1019_v37, %v916_v2 }
 0x621   : > { %v1025_v39 = vsel %vm483_vm1, %v1023_v38, 0.0 }
 0x622   : > { %1026 = vadd.xlane.f32.xlu0 %v1025_v39 }
 0x624   : > { %v1020_v40 = vpop.f32.mrf.mxu2 }
 0x625   : > { %v1021_v41 = vadd.f32 %v1020_v40, %v980_v35 }
 0x627   : > { %v1024_v42 = vadd.f32 %v1021_v41, %v917_v3 }
 0x629   : > { %v1028_v43 = vsel %vm483_vm1, %v1024_v42, 0.0 }
 0x62a   : > { %1029 = vadd.xlane.f32.xlu1 %v1028_v43 }
 0x695   : > { %v1027_v44 = vpop.xlane.xlu0 %1026 }
 0x696   : > { %v1031_v45 = vmul.f32 %v1027_v44, %v1935_v28 }
 0x698   : > { %v1033_v46 = vsub.f32 %v1023_v38, %v1031_v45 }
 0x69a   : > { %v1035_v47 = vmul.f32 %v1033_v46, %v1033_v46 }
 0x69c   : > { %v1037_v48 = vsel %vm483_vm1, %v1035_v47, 0.0 }
 0x69d   : > { %v1030_v10 = vpop.xlane.xlu1 %1029  ;;  %1038 = vadd.xlane.f32.xlu1 %v1037_v48 }
 0x69e   : > { %v1032_v49 = vmul.f32 %v1030_v10, %v1935_v28 }
 0x6a0   : > { %v1034_v50 = vsub.f32 %v1024_v42, %v1032_v49 }
 0x6a2   : > { %v1036_v51 = vmul.f32 %v1034_v50, %v1034_v50 }
 0x6a4   : > { %v1040_v52 = vsel %vm483_vm1, %v1036_v51, 0.0 }
 0x6a5   : > { %1041 = vadd.xlane.f32.xlu1 %v1040_v52 }
 0x710   : > { %v1039_v53 = vpop.xlane.xlu1 %1038 }
 0x711   : > { %v1043_v54 = vmul.f32 %v1039_v53, %v1935_v28 }
 0x713   : > { %v1045_v55 = vadd.f32 1e-05, %v1043_v54 }
 0x715   : > { %1520 = vrsqrt.f32 %v1045_v55  ;;  %vm1053_vm14 = vweird.f32 %v1045_v55 }
 0x718   : > { %v1042_v56 = vpop.xlane.xlu1 %1041 }
 0x719   : > { %v1044_v57 = vmul.f32 %v1042_v56, %v1935_v28 }
 0x71b   : > { %v1521_v58 = vpop.eup %1520  ;;  %v1046_v59 = vadd.f32 1e-05, %v1044_v57 }
 0x71c   : > { %v1048_v60 = vmul.f32 %v1521_v58, %v1045_v55  ;;  %vm1054_vm13 = vweird.f32 %v1521_v58 }
 0x71d   : > { %1522 = vrsqrt.f32 %v1046_v59  ;;  %vm1055_vm15 = vmor %vm1053_vm14, %vm1054_vm13  ;;  %vm1063_vm2 = vweird.f32 %v1046_v59 }
 0x71e   : > { %v1049_v61 = vmul.f32 %v1521_v58, %v1048_v60 }
 0x720   : > { %v1050_v62 = vmul.f32 0.5, %v1049_v61 }
 0x722   : > { %v1051_v0 = vsub.f32 1.5, %v1050_v62 }
 0x723   : > { %v1523_v1 = vpop.eup %1522 }
 0x724   : > { %v1052_v2 = vmul.f32 %v1521_v58, %v1051_v0  ;;  %v1058_v3 = vmul.f32 %v1523_v1, %v1046_v59  ;;  %vm1064_vm0 = vweird.f32 %v1523_v1 }
 0x725   : > { %vm1065_vm3 = vmor %vm1063_vm2, %vm1064_vm0 }
 0x726   : > { %v1056_v5 = vsel %vm1055_vm15, %v1521_v58, %v1052_v2  ;;  %v1059_v6 = vmul.f32 %v1523_v1, %v1058_v3 }
 0x727   : > { %v1067_v11 = vmul.f32 %v1056_v5, %v1033_v46 }
 0x728   : > { %v1060_v28 = vmul.f32 0.5, %v1059_v6 }
 0x729   : > { %v1070_v12 = vmul.f32 %v1069_v4, %v1067_v11 }
 0x72a   : > { %v1061_v13 = vsub.f32 1.5, %v1060_v28 }
 0x72b   : > { %v1073_v14 = vadd.f32 %v1072_v9, %v1070_v12 }
 0x72c   : > { %v1062_v15 = vmul.f32 %v1523_v1, %v1061_v13 }
 0x72d   : > { %1075 = vst.msk [vmem:[#allocation2] sm:$0xff] %vm483_vm1, %v1073_v14 }
 0x72e   : > { %v1066_v16 = vsel %vm1065_vm3, %v1523_v1, %v1062_v15 }
 0x72f   : > { %v1068_v17 = vmul.f32 %v1066_v16, %v1034_v50 }
 0x731   : > { %v1071_v18 = vmul.f32 %v1069_v4, %v1068_v17  ;;  %1080 = sbr.rel (%p1377_p1) target bundleno = 2126 (0x84e), region = 76 }
 0x733   : > { %v1074_v19 = vadd.f32 %v1072_v9, %v1071_v18 }
 0x735   : > { %1076 = vst.msk [vmem:[#allocation2 + $0x8] sm:$0xff] %vm483_vm1, %v1074_v19 }
 0x736   : > { %v1419_v20 = vld [vmem:[#allocation6 + $0x8] sm:$0xff]  ;;  %v1082_v21 = vpack.c.bf16 %v1073_v14, %v1073_v14  ;;  %v1083_v22 = vpack.c.bf16 %v1074_v19, %v1074_v19  ;;  %v1418_v23 = vld [vmem:[#allocation6] sm:$0xff]  ;;  %vm1094_vm4 = vcmask 1041409   ;;  %v1421_v29 = vld [vmem:[#allocation8 + $0x8] sm:$0xff] }
 0x737   : > { %1118 = vmatpush.bf16.msra.mxu0 %v1419_v20  ;;  %1153 = vmatpush.bf16.msra.mxu1 %v1421_v29  ;;  %v1420_v30 = vld [vmem:[#allocation8] sm:$0xff] }
 0x738   : > { %v1091_v24 = vunpack.c.l.b16 %v1082_v21  ;;  %v1092_v25 = vunpack.c.l.b16 %v1083_v22  ;;  %v1081_v31 = vld [vmem:[%s1998_s8] sm:$0x3] }
 0x739   : > { %v1088_v8 = vperm.slane %v1081_v31, 0  ;;  %v1131_v37 = vperm.slane %v1081_v31, 1 }
 0x73a   : > { %v1093_v26 = vrot.slane %v1092_v25, 7 }
 0x73b   : > { %1119 = vmatpush.bf16.msra.mxu0 %v1418_v23  ;;  %1154 = vmatpush.bf16.msra.mxu1 %v1420_v30 }
 0x73c   : > { %v1095_v27 = vsel %vm1094_vm4, %v1093_v26, %v1091_v24 }
 0x73d   : > { %v1096_v7 = vpack.c.b16 %v1095_v27, %v1095_v27 }
 0x73f   : > { %1386 = vmatmul.msk.bf16.vlgmr.msra.gmra.mxu0 %vm483_vm1, %v1096_v7 }
 0x7bc   : > { %v1121_v32 = vpop.f32.mrf.mxu0 }
 0x7bd   : > { %v1122_v33 = vadd.f32 %v1121_v32, %v1088_v8 }
 0x7bf   : > { %1524 = vtanh.f32 %v1122_v33 }
 0x7c4   : > { %v1123_v34 = vpop.f32.mrf.mxu0 }
 0x7c5   : > { %v1525_v35 = vpop.eup %1524 }
 0x7c6   : > { %v1126_v36 = vpack.c.bf16 %v1525_v35, %v1525_v35 }
 0x7c8   : > { %1395 = vmatmul.msk.bf16.vlgmr.msra.gmra.mxu1 %vm483_vm1, %v1126_v36 }
 0x845   : > { %v1156_v38 = vpop.f32.mrf.mxu1 }
 0x846   : > { %v1157_v39 = vadd.f32 %v1156_v38, %v1131_v37 }
 0x848   : > { %1160 = vst [vmem:[#allocation9] sm:$0x3] %v1157_v39 }
 0x84d   : > { %v1158_v40 = vpop.f32.mrf.mxu1 }
 0x84e PF: > { %p1452_p4 = scmp.eq.s32.totalorder %s1765_s13, 1  ;;  %s1695_s14 = smov [#allocation9]  }
 0x84f   : > { %s1167_s20 = sshll.u32 %s1695_s14, 4  ;;  %s1169_s22 = sshll.u32 %s1999_s9, 4  ;;  %s1168_s20 = int_to_ptr.vmem [resolvable:$true] %s1167_s20  ;;  %s1170_s22 = int_to_ptr.hbm [resolvable:$true] %s1169_s22 }
 0x850   : > { %1433 = dma.vmem_to_hbm [thread:$0]  (%p1452_p4), %s1168_s20, 32, %s1170_s22, [#allocation5]  }
 0x851   : > { %1669 = dma.done.wait (%p1452_p4), [#allocation5], 32  }
 0x852   : > { %1671 = vsyncadd (%p1452_p4), [#allocation5], 4294967264 }
 0x853 PF: > { %p21_p5 = scmp.ge.s32.totalorder %s1799_s28, 4   ;;  %s2009_s30 = smov %s1678_s10 }
 0x854   : > { %s2010_s10 = smov %s1682_s11  ;;  %s2011_s11 = smov %s1809_s16 }
 0x855   : > { %s2012_s12 = smov %s1799_s28  ;;  %23 = sbr.rel (!%p21_p5) target bundleno = 5 (0x5), region = 121 }
 0x85a   :  { %1183 = vsyncpa [#allocation4], 1 }
 0x85b   :  { %1185 = vsyncpa [#allocation4 + $0x1], 1 }
 0x85c   :  { %1186 = vsyncpa [#allocation7], 1 }
 0x85d   :  { %1187 = vsyncpa [#allocation5], 1 }
 0x85e   :  { %1189 = vsyncpa [#allocation5 + $0x1], 1 }

</bundles_post_ra>
